<compile_context>
chip_gen: v5e
topology: v5e:2x2
jax: 0.10.0
libtpu: 0.0.40
codegen_flags: <defaults>
</compile_context>

<pallas_src>
import functools

import jax
import jax.numpy as jnp
from jax.experimental import pallas as pl
from jax.experimental.pallas import tpu as pltpu

HIDDEN_SIZE = 32
INPUT_SIZE = 1
NUM_CLASSES = 1
NUM_LAYERS = 1  # single-layer LSTM, as in the module

_SUBLANE = 8    # f32 sublane multiple
_LANE = 128     # vreg lane width


def lstm_kernel(x_ref, wih_ref, whh_ref, b_ref, wfc_ref, bfc_ref, out_ref,
                pre_scr):
    # x_ref:   (T*Bp, I)   time-major input, batch rows zero-padded to Bp, f32
    # wih_ref: (I, 4H)     input->gate weights (i/f/o cols pre-scaled 0.5), f32
    # whh_ref: (H, 4H)     hidden->gate weights (same scaling), bf16
    # b_ref:   (1, 4H)     b_ih + b_hh (same scaling), f32
    # wfc_ref: (H, Cp)     fc weights^T, zero-padded to full 128 lanes, bf16
    # bfc_ref: (1, Cp)     fc bias, zero-padded, f32
    # out_ref: (Bp, Cp)    f32, lane-dense unmasked store
    # pre_scr: (T*Bp, 4H)  VMEM scratch for the hoisted input projection
    Bp = out_ref.shape[0]
    G = whh_ref.shape[1]               # 4*H (== 128 for H=32)
    H = G // 4
    T = x_ref.shape[0] // Bp

    # ---- hoisted, recurrence-free input projection (prologue only) ---------
    if x_ref.shape[1] == 1:
        # INPUT_SIZE == 1: lane/sublane broadcast FMA on the VPU, no MXU.
        pre_scr[...] = x_ref[...] * wih_ref[...] + b_ref[...]
    else:
        pre_scr[...] = (
            jnp.dot(x_ref[...], wih_ref[...],
                    preferred_element_type=jnp.float32) + b_ref[...])

    h = jnp.zeros((Bp, H), jnp.float32)    # h0 = 0
    c = jnp.zeros((Bp, H), jnp.float32)    # c0 = 0

    # Static full unroll (T known at trace time) so the LLO scheduler can
    # overlap MXU/EUP/VPU work across adjacent steps up to the h/c dependence.
    # TODO(synk): on v5e/v6e a further win is staging W_hh once in the MXU
    # weight registers (pltpu.matmul_push_rhs / matmul_acc_lhs / matmul_pop);
    # kept as portable jnp.dot here because v7x's MRB result path differs and
    # the compact bf16 RHS is already only 8 KiB per step.
    for t in range(T):
        gates = pre_scr[t * Bp:(t + 1) * Bp, :] + jnp.dot(
            h.astype(whh_ref.dtype), whh_ref[...],
            preferred_element_type=jnp.float32)                  # (Bp, 4H)
        # One EUP push over the whole gate slab; sigmoid(z) = 0.5*tanh(z/2)+0.5
        # with the z/2 already folded into the i/f/o weight & bias columns.
        tg = jnp.tanh(gates)
        i_g = tg[:, 0 * H:1 * H] * 0.5 + 0.5
        f_g = tg[:, 1 * H:2 * H] * 0.5 + 0.5
        g_g = tg[:, 2 * H:3 * H]
        o_g = tg[:, 3 * H:4 * H] * 0.5 + 0.5
        c = f_g * c + i_g * g_g
        h = o_g * jnp.tanh(c)

    # fc head on the last timestep's hidden state: out = h_T @ W_fc^T + b_fc.
    out_ref[...] = (
        jnp.dot(h.astype(wfc_ref.dtype), wfc_ref[...],
                preferred_element_type=jnp.float32) + bfc_ref[...]
    ).astype(out_ref.dtype)


def _round_up(n, m):
    return ((n + m - 1) // m) * m


def _scale_ifo_cols(mat_2d, H):
    """(K, 4H) gate-major (i,f,g,o): scale i/f/o columns by 0.5 so the kernel
    can evaluate sigmoid as 0.5*tanh(0.5*z) + 0.5 with a single tanh."""
    m = jnp.asarray(mat_2d, jnp.float32)
    scale = jnp.concatenate([
        jnp.full((2 * H,), 0.5, jnp.float32),   # i, f
        jnp.ones((H,), jnp.float32),            # g (plain tanh)
        jnp.full((H,), 0.5, jnp.float32)])      # o
    return m * scale[None, :]


def pack_params(w_ih, w_hh, b_ih, b_hh, w_fc, b_fc):
    """One-time weight packing — keep OUT of the per-forward hot path."""
    H = w_hh.shape[1]          # w_hh: (4H, H)
    C = w_fc.shape[0]          # w_fc: (C, H)
    Cp = _round_up(C, _LANE)   # lane-dense output store

    wih_p = _scale_ifo_cols(jnp.asarray(w_ih, jnp.float32).T, H)        # (I, 4H) f32
    whh_p = _scale_ifo_cols(jnp.asarray(w_hh, jnp.float32).T, H).astype(
        jnp.bfloat16)                                                   # (H, 4H) bf16
    b_p = _scale_ifo_cols(
        (jnp.asarray(b_ih, jnp.float32)
         + jnp.asarray(b_hh, jnp.float32)).reshape(1, 4 * H), H)        # (1, 4H) f32
    wfc_p = jnp.zeros((H, Cp), jnp.bfloat16).at[:, :C].set(
        jnp.asarray(w_fc, jnp.float32).T.astype(jnp.bfloat16))          # (H, Cp) bf16
    bfc_p = jnp.zeros((1, Cp), jnp.float32).at[0, :C].set(
        jnp.asarray(b_fc, jnp.float32))                                 # (1, Cp) f32
    return (wih_p, whh_p, b_p, wfc_p, bfc_p)


@functools.partial(jax.jit, static_argnames=("num_classes",))
def lstm_forward(x, packed, *, num_classes=NUM_CLASSES):
    """x: (B, T, I) float32 — matches torch batch_first=True."""
    wih_p, whh_p, b_p, wfc_p, bfc_p = packed
    B, T, I = x.shape
    H, G = whh_p.shape                  # G = 4H
    Cp = wfc_p.shape[1]

    Bp = _round_up(B, _SUBLANE)         # f32 sublane multiple

    # Time-major, batch-padded input, flattened to 2D for the hoisted FMA.
    x_tbi = jnp.transpose(x, (1, 0, 2)).astype(jnp.float32)             # (T, B, I)
    x_pad = jnp.zeros((T, Bp, I), jnp.float32).at[:, :B, :].set(x_tbi)
    x2d = x_pad.reshape(T * Bp, I)                                      # (T*Bp, I)

    vmem_spec = pl.BlockSpec(memory_space=pltpu.MemorySpace.VMEM)
    out_pad = pl.pallas_call(
        lstm_kernel,
        out_shape=jax.ShapeDtypeStruct((Bp, Cp), jnp.float32),
        in_specs=[vmem_spec] * 6,
        out_specs=vmem_spec,
        scratch_shapes=[
            pltpu.VMEM((T * Bp, G), jnp.float32),   # hoisted pre-gates
        ],
        # TODO(synk): if batch / #sequences grows, add a leading batch grid
        # axis with dimension_semantics=("parallel",) and constant weight
        # index_maps so both v7x TensorCores are used without re-DMA'ing W.
    )(x2d, wih_p, whh_p, b_p, wfc_p, bfc_p)

    return out_pad[:B, :num_classes]


def init_params(key, input_size, hidden_size, num_classes):
    """Deterministic init mimicking PyTorch's U(-1/sqrt(H), 1/sqrt(H))."""
    k = 1.0 / jnp.sqrt(jnp.float32(hidden_size))
    keys = jax.random.split(key, 6)
    w_ih = jax.random.uniform(keys[0], (4 * hidden_size, input_size),
                              jnp.float32, -k, k)
    w_hh = jax.random.uniform(keys[1], (4 * hidden_size, hidden_size),
                              jnp.float32, -k, k)
    b_ih = jax.random.uniform(keys[2], (4 * hidden_size,), jnp.float32, -k, k)
    b_hh = jax.random.uniform(keys[3], (4 * hidden_size,), jnp.float32, -k, k)
    w_fc = jax.random.uniform(keys[4], (num_classes, hidden_size),
                              jnp.float32, -k, k)
    b_fc = jax.random.uniform(keys[5], (num_classes,), jnp.float32, -k, k)
    return w_ih, w_hh, b_ih, b_hh, w_fc, b_fc


def lstm_reference(x, w_ih, w_hh, b_ih, b_hh, w_fc, b_fc):
    """Pure-JAX f32 reference of the same forward pass (sanity check)."""
    B, T, _ = x.shape
    H = w_hh.shape[1]
    h = jnp.zeros((B, H), jnp.float32)
    c = jnp.zeros((B, H), jnp.float32)
    for t in range(T):
        gates = x[:, t, :] @ w_ih.T + b_ih + h @ w_hh.T + b_hh
        i = jax.nn.sigmoid(gates[:, 0:H])
        f = jax.nn.sigmoid(gates[:, H:2 * H])
        g = jnp.tanh(gates[:, 2 * H:3 * H])
        o = jax.nn.sigmoid(gates[:, 3 * H:4 * H])
        c = f * c + i * g
        h = o * jnp.tanh(c)
    return h @ w_fc.T + b_fc


if __name__ == "__main__":
    B, T = 2, 8  # small batch / sequence length

    key = jax.random.PRNGKey(0)
    kx, kp = jax.random.split(key)
    x = jax.random.normal(kx, (B, T, INPUT_SIZE), jnp.float32)
    params = init_params(kp, INPUT_SIZE, HIDDEN_SIZE, NUM_CLASSES)

    packed = pack_params(*params)              # one-time, off the hot path
    packed = jax.block_until_ready(packed)

    out = lstm_forward(x, packed, num_classes=NUM_CLASSES)
    out = jax.block_until_ready(out)

    ref = lstm_reference(x, *params)
    assert out.shape == (B, NUM_CLASSES)
    # bf16 recurrent / fc weights -> looser tolerance vs the f32 reference.
    assert jnp.allclose(out, ref, atol=2e-2, rtol=2e-2), (out, ref)

    print("KERNEL_OK")
</pallas_src>

<mosaic_0001>
module attributes {stable_mosaic.version = 11 : i64} {
  func.func @lstm_kernel(%arg0: memref<64x1xf32, #tpu.memory_space<vmem>>, %arg1: memref<1x128xf32, #tpu.memory_space<vmem>>, %arg2: memref<32x128xbf16, #tpu.memory_space<vmem>>, %arg3: memref<1x128xf32, #tpu.memory_space<vmem>>, %arg4: memref<32x128xbf16, #tpu.memory_space<vmem>>, %arg5: memref<1x128xf32, #tpu.memory_space<vmem>>, %arg6: memref<8x128xf32, #tpu.memory_space<vmem>>, %arg7: memref<64x128xf32, #tpu.memory_space<vmem>>) attributes {dimension_semantics = [], scalar_prefetch = 0 : i64, scratch_operands = 1 : i64, tpu.core_type = #tpu.core_type<tc>} {
    %c0 = arith.constant 0 : index
    %c0_0 = arith.constant 0 : index
    %0 = vector.load %arg0[%c0, %c0_0] : memref<64x1xf32, #tpu.memory_space<vmem>>, vector<64x1xf32>
    %c0_1 = arith.constant 0 : index
    %c0_2 = arith.constant 0 : index
    %1 = vector.load %arg1[%c0_1, %c0_2] : memref<1x128xf32, #tpu.memory_space<vmem>>, vector<1x128xf32>
    %2 = vector.broadcast %0 : vector<64x1xf32> to vector<64x128xf32>
    %3 = vector.broadcast %1 : vector<1x128xf32> to vector<64x128xf32>
    %4 = arith.mulf %2, %3 : vector<64x128xf32>
    %c0_3 = arith.constant 0 : index
    %c0_4 = arith.constant 0 : index
    %5 = vector.load %arg3[%c0_3, %c0_4] : memref<1x128xf32, #tpu.memory_space<vmem>>, vector<1x128xf32>
    %6 = vector.broadcast %5 : vector<1x128xf32> to vector<64x128xf32>
    %7 = arith.addf %4, %6 : vector<64x128xf32>
    %c0_5 = arith.constant 0 : index
    %c0_6 = arith.constant 0 : index
    %8 = vector.load %arg7[%c0_5, %c0_6] : memref<64x128xf32, #tpu.memory_space<vmem>>, vector<64x128xf32>
    tpu.vector_store %arg7[%c0_5, %c0_6], %7 {strides = array<i32>} : memref<64x128xf32, #tpu.memory_space<vmem>>, vector<64x128xf32>,
    %cst = arith.constant 0.000000e+00 : f32
    %9 = vector.broadcast %cst : f32 to vector<8x32xf32>
    %cst_7 = arith.constant 0.000000e+00 : f32
    %10 = vector.broadcast %cst_7 : f32 to vector<8x32xf32>
    %c0_8 = arith.constant 0 : index
    %c0_9 = arith.constant 0 : index
    %11 = vector.load %arg7[%c0_8, %c0_9] : memref<64x128xf32, #tpu.memory_space<vmem>>, vector<8x128xf32>
    %12 = arith.truncf %9 : vector<8x32xf32> to vector<8x32xbf16>
    %c0_10 = arith.constant 0 : index
    %c0_11 = arith.constant 0 : index
    %13 = vector.load %arg2[%c0_10, %c0_11] : memref<32x128xbf16, #tpu.memory_space<vmem>>, vector<32x128xbf16>
    %cst_12 = arith.constant dense<0.000000e+00> : vector<8x128xf32>
    %14 = tpu.matmul %12, %13, %cst_12 {dimension_numbers = #tpu.dot_dimension_numbers<[1], [0], [0], [1], [0, 0, 1, 1], [], []>} : vector<8x32xbf16>, vector<32x128xbf16>, vector<8x128xf32> -> vector<8x128xf32>
    %15 = arith.addf %11, %14 : vector<8x128xf32>
    %16 = math.tanh %15 : vector<8x128xf32>
    %17 = vector.extract_strided_slice %16 {offsets = [0, 0], sizes = [8, 32], strides = [1, 1]} : vector<8x128xf32> to vector<8x32xf32>
    %cst_13 = arith.constant 5.000000e-01 : f32
    %18 = vector.broadcast %cst_13 : f32 to vector<8x32xf32>
    %19 = arith.mulf %17, %18 : vector<8x32xf32>
    %cst_14 = arith.constant 5.000000e-01 : f32
    %20 = vector.broadcast %cst_14 : f32 to vector<8x32xf32>
    %21 = arith.addf %19, %20 : vector<8x32xf32>
    %22 = vector.extract_strided_slice %16 {offsets = [0, 32], sizes = [8, 32], strides = [1, 1]} : vector<8x128xf32> to vector<8x32xf32>
    %cst_15 = arith.constant 5.000000e-01 : f32
    %23 = vector.broadcast %cst_15 : f32 to vector<8x32xf32>
    %24 = arith.mulf %22, %23 : vector<8x32xf32>
    %cst_16 = arith.constant 5.000000e-01 : f32
    %25 = vector.broadcast %cst_16 : f32 to vector<8x32xf32>
    %26 = arith.addf %24, %25 : vector<8x32xf32>
    %27 = vector.extract_strided_slice %16 {offsets = [0, 64], sizes = [8, 32], strides = [1, 1]} : vector<8x128xf32> to vector<8x32xf32>
    %28 = vector.extract_strided_slice %16 {offsets = [0, 96], sizes = [8, 32], strides = [1, 1]} : vector<8x128xf32> to vector<8x32xf32>
    %cst_17 = arith.constant 5.000000e-01 : f32
    %29 = vector.broadcast %cst_17 : f32 to vector<8x32xf32>
    %30 = arith.mulf %28, %29 : vector<8x32xf32>
    %cst_18 = arith.constant 5.000000e-01 : f32
    %31 = vector.broadcast %cst_18 : f32 to vector<8x32xf32>
    %32 = arith.addf %30, %31 : vector<8x32xf32>
    %33 = arith.mulf %26, %10 : vector<8x32xf32>
    %34 = arith.mulf %21, %27 : vector<8x32xf32>
    %35 = arith.addf %33, %34 : vector<8x32xf32>
    %36 = math.tanh %35 : vector<8x32xf32>
    %37 = arith.mulf %32, %36 : vector<8x32xf32>
    %c8 = arith.constant 8 : index
    %c0_19 = arith.constant 0 : index
    %38 = vector.load %arg7[%c8, %c0_19] : memref<64x128xf32, #tpu.memory_space<vmem>>, vector<8x128xf32>
    %39 = arith.truncf %37 : vector<8x32xf32> to vector<8x32xbf16>
    %c0_20 = arith.constant 0 : index
    %c0_21 = arith.constant 0 : index
    %40 = vector.load %arg2[%c0_20, %c0_21] : memref<32x128xbf16, #tpu.memory_space<vmem>>, vector<32x128xbf16>
    %cst_22 = arith.constant dense<0.000000e+00> : vector<8x128xf32>
    %41 = tpu.matmul %39, %40, %cst_22 {dimension_numbers = #tpu.dot_dimension_numbers<[1], [0], [0], [1], [0, 0, 1, 1], [], []>} : vector<8x32xbf16>, vector<32x128xbf16>, vector<8x128xf32> -> vector<8x128xf32>
    %42 = arith.addf %38, %41 : vector<8x128xf32>
    %43 = math.tanh %42 : vector<8x128xf32>
    %44 = vector.extract_strided_slice %43 {offsets = [0, 0], sizes = [8, 32], strides = [1, 1]} : vector<8x128xf32> to vector<8x32xf32>
    %cst_23 = arith.constant 5.000000e-01 : f32
    %45 = vector.broadcast %cst_23 : f32 to vector<8x32xf32>
    %46 = arith.mulf %44, %45 : vector<8x32xf32>
    %cst_24 = arith.constant 5.000000e-01 : f32
    %47 = vector.broadcast %cst_24 : f32 to vector<8x32xf32>
    %48 = arith.addf %46, %47 : vector<8x32xf32>
    %49 = vector.extract_strided_slice %43 {offsets = [0, 32], sizes = [8, 32], strides = [1, 1]} : vector<8x128xf32> to vector<8x32xf32>
    %cst_25 = arith.constant 5.000000e-01 : f32
    %50 = vector.broadcast %cst_25 : f32 to vector<8x32xf32>
    %51 = arith.mulf %49, %50 : vector<8x32xf32>
    %cst_26 = arith.constant 5.000000e-01 : f32
    %52 = vector.broadcast %cst_26 : f32 to vector<8x32xf32>
    %53 = arith.addf %51, %52 : vector<8x32xf32>
    %54 = vector.extract_strided_slice %43 {offsets = [0, 64], sizes = [8, 32], strides = [1, 1]} : vector<8x128xf32> to vector<8x32xf32>
    %55 = vector.extract_strided_slice %43 {offsets = [0, 96], sizes = [8, 32], strides = [1, 1]} : vector<8x128xf32> to vector<8x32xf32>
    %cst_27 = arith.constant 5.000000e-01 : f32
    %56 = vector.broadcast %cst_27 : f32 to vector<8x32xf32>
    %57 = arith.mulf %55, %56 : vector<8x32xf32>
    %cst_28 = arith.constant 5.000000e-01 : f32
    %58 = vector.broadcast %cst_28 : f32 to vector<8x32xf32>
    %59 = arith.addf %57, %58 : vector<8x32xf32>
    %60 = arith.mulf %53, %35 : vector<8x32xf32>
    %61 = arith.mulf %48, %54 : vector<8x32xf32>
    %62 = arith.addf %60, %61 : vector<8x32xf32>
    %63 = math.tanh %62 : vector<8x32xf32>
    %64 = arith.mulf %59, %63 : vector<8x32xf32>
    %c16 = arith.constant 16 : index
    %c0_29 = arith.constant 0 : index
    %65 = vector.load %arg7[%c16, %c0_29] : memref<64x128xf32, #tpu.memory_space<vmem>>, vector<8x128xf32>
    %66 = arith.truncf %64 : vector<8x32xf32> to vector<8x32xbf16>
    %c0_30 = arith.constant 0 : index
    %c0_31 = arith.constant 0 : index
    %67 = vector.load %arg2[%c0_30, %c0_31] : memref<32x128xbf16, #tpu.memory_space<vmem>>, vector<32x128xbf16>
    %cst_32 = arith.constant dense<0.000000e+00> : vector<8x128xf32>
    %68 = tpu.matmul %66, %67, %cst_32 {dimension_numbers = #tpu.dot_dimension_numbers<[1], [0], [0], [1], [0, 0, 1, 1], [], []>} : vector<8x32xbf16>, vector<32x128xbf16>, vector<8x128xf32> -> vector<8x128xf32>
    %69 = arith.addf %65, %68 : vector<8x128xf32>
    %70 = math.tanh %69 : vector<8x128xf32>
    %71 = vector.extract_strided_slice %70 {offsets = [0, 0], sizes = [8, 32], strides = [1, 1]} : vector<8x128xf32> to vector<8x32xf32>
    %cst_33 = arith.constant 5.000000e-01 : f32
    %72 = vector.broadcast %cst_33 : f32 to vector<8x32xf32>
    %73 = arith.mulf %71, %72 : vector<8x32xf32>
    %cst_34 = arith.constant 5.000000e-01 : f32
    %74 = vector.broadcast %cst_34 : f32 to vector<8x32xf32>
    %75 = arith.addf %73, %74 : vector<8x32xf32>
    %76 = vector.extract_strided_slice %70 {offsets = [0, 32], sizes = [8, 32], strides = [1, 1]} : vector<8x128xf32> to vector<8x32xf32>
    %cst_35 = arith.constant 5.000000e-01 : f32
    %77 = vector.broadcast %cst_35 : f32 to vector<8x32xf32>
    %78 = arith.mulf %76, %77 : vector<8x32xf32>
    %cst_36 = arith.constant 5.000000e-01 : f32
    %79 = vector.broadcast %cst_36 : f32 to vector<8x32xf32>
    %80 = arith.addf %78, %79 : vector<8x32xf32>
    %81 = vector.extract_strided_slice %70 {offsets = [0, 64], sizes = [8, 32], strides = [1, 1]} : vector<8x128xf32> to vector<8x32xf32>
    %82 = vector.extract_strided_slice %70 {offsets = [0, 96], sizes = [8, 32], strides = [1, 1]} : vector<8x128xf32> to vector<8x32xf32>
    %cst_37 = arith.constant 5.000000e-01 : f32
    %83 = vector.broadcast %cst_37 : f32 to vector<8x32xf32>
    %84 = arith.mulf %82, %83 : vector<8x32xf32>
    %cst_38 = arith.constant 5.000000e-01 : f32
    %85 = vector.broadcast %cst_38 : f32 to vector<8x32xf32>
    %86 = arith.addf %84, %85 : vector<8x32xf32>
    %87 = arith.mulf %80, %62 : vector<8x32xf32>
    %88 = arith.mulf %75, %81 : vector<8x32xf32>
    %89 = arith.addf %87, %88 : vector<8x32xf32>
    %90 = math.tanh %89 : vector<8x32xf32>
    %91 = arith.mulf %86, %90 : vector<8x32xf32>
    %c24 = arith.constant 24 : index
    %c0_39 = arith.constant 0 : index
    %92 = vector.load %arg7[%c24, %c0_39] : memref<64x128xf32, #tpu.memory_space<vmem>>, vector<8x128xf32>
    %93 = arith.truncf %91 : vector<8x32xf32> to vector<8x32xbf16>
    %c0_40 = arith.constant 0 : index
    %c0_41 = arith.constant 0 : index
    %94 = vector.load %arg2[%c0_40, %c0_41] : memref<32x128xbf16, #tpu.memory_space<vmem>>, vector<32x128xbf16>
    %cst_42 = arith.constant dense<0.000000e+00> : vector<8x128xf32>
    %95 = tpu.matmul %93, %94, %cst_42 {dimension_numbers = #tpu.dot_dimension_numbers<[1], [0], [0], [1], [0, 0, 1, 1], [], []>} : vector<8x32xbf16>, vector<32x128xbf16>, vector<8x128xf32> -> vector<8x128xf32>
    %96 = arith.addf %92, %95 : vector<8x128xf32>
    %97 = math.tanh %96 : vector<8x128xf32>
    %98 = vector.extract_strided_slice %97 {offsets = [0, 0], sizes = [8, 32], strides = [1, 1]} : vector<8x128xf32> to vector<8x32xf32>
    %cst_43 = arith.constant 5.000000e-01 : f32
    %99 = vector.broadcast %cst_43 : f32 to vector<8x32xf32>
    %100 = arith.mulf %98, %99 : vector<8x32xf32>
    %cst_44 = arith.constant 5.000000e-01 : f32
    %101 = vector.broadcast %cst_44 : f32 to vector<8x32xf32>
    %102 = arith.addf %100, %101 : vector<8x32xf32>
    %103 = vector.extract_strided_slice %97 {offsets = [0, 32], sizes = [8, 32], strides = [1, 1]} : vector<8x128xf32> to vector<8x32xf32>
    %cst_45 = arith.constant 5.000000e-01 : f32
    %104 = vector.broadcast %cst_45 : f32 to vector<8x32xf32>
    %105 = arith.mulf %103, %104 : vector<8x32xf32>
    %cst_46 = arith.constant 5.000000e-01 : f32
    %106 = vector.broadcast %cst_46 : f32 to vector<8x32xf32>
    %107 = arith.addf %105, %106 : vector<8x32xf32>
    %108 = vector.extract_strided_slice %97 {offsets = [0, 64], sizes = [8, 32], strides = [1, 1]} : vector<8x128xf32> to vector<8x32xf32>
    %109 = vector.extract_strided_slice %97 {offsets = [0, 96], sizes = [8, 32], strides = [1, 1]} : vector<8x128xf32> to vector<8x32xf32>
    %cst_47 = arith.constant 5.000000e-01 : f32
    %110 = vector.broadcast %cst_47 : f32 to vector<8x32xf32>
    %111 = arith.mulf %109, %110 : vector<8x32xf32>
    %cst_48 = arith.constant 5.000000e-01 : f32
    %112 = vector.broadcast %cst_48 : f32 to vector<8x32xf32>
    %113 = arith.addf %111, %112 : vector<8x32xf32>
    %114 = arith.mulf %107, %89 : vector<8x32xf32>
    %115 = arith.mulf %102, %108 : vector<8x32xf32>
    %116 = arith.addf %114, %115 : vector<8x32xf32>
    %117 = math.tanh %116 : vector<8x32xf32>
    %118 = arith.mulf %113, %117 : vector<8x32xf32>
    %c32 = arith.constant 32 : index
    %c0_49 = arith.constant 0 : index
    %119 = vector.load %arg7[%c32, %c0_49] : memref<64x128xf32, #tpu.memory_space<vmem>>, vector<8x128xf32>
    %120 = arith.truncf %118 : vector<8x32xf32> to vector<8x32xbf16>
    %c0_50 = arith.constant 0 : index
    %c0_51 = arith.constant 0 : index
    %121 = vector.load %arg2[%c0_50, %c0_51] : memref<32x128xbf16, #tpu.memory_space<vmem>>, vector<32x128xbf16>
    %cst_52 = arith.constant dense<0.000000e+00> : vector<8x128xf32>
    %122 = tpu.matmul %120, %121, %cst_52 {dimension_numbers = #tpu.dot_dimension_numbers<[1], [0], [0], [1], [0, 0, 1, 1], [], []>} : vector<8x32xbf16>, vector<32x128xbf16>, vector<8x128xf32> -> vector<8x128xf32>
    %123 = arith.addf %119, %122 : vector<8x128xf32>
    %124 = math.tanh %123 : vector<8x128xf32>
    %125 = vector.extract_strided_slice %124 {offsets = [0, 0], sizes = [8, 32], strides = [1, 1]} : vector<8x128xf32> to vector<8x32xf32>
    %cst_53 = arith.constant 5.000000e-01 : f32
    %126 = vector.broadcast %cst_53 : f32 to vector<8x32xf32>
    %127 = arith.mulf %125, %126 : vector<8x32xf32>
    %cst_54 = arith.constant 5.000000e-01 : f32
    %128 = vector.broadcast %cst_54 : f32 to vector<8x32xf32>
    %129 = arith.addf %127, %128 : vector<8x32xf32>
    %130 = vector.extract_strided_slice %124 {offsets = [0, 32], sizes = [8, 32], strides = [1, 1]} : vector<8x128xf32> to vector<8x32xf32>
    %cst_55 = arith.constant 5.000000e-01 : f32
    %131 = vector.broadcast %cst_55 : f32 to vector<8x32xf32>
    %132 = arith.mulf %130, %131 : vector<8x32xf32>
    %cst_56 = arith.constant 5.000000e-01 : f32
    %133 = vector.broadcast %cst_56 : f32 to vector<8x32xf32>
    %134 = arith.addf %132, %133 : vector<8x32xf32>
    %135 = vector.extract_strided_slice %124 {offsets = [0, 64], sizes = [8, 32], strides = [1, 1]} : vector<8x128xf32> to vector<8x32xf32>
    %136 = vector.extract_strided_slice %124 {offsets = [0, 96], sizes = [8, 32], strides = [1, 1]} : vector<8x128xf32> to vector<8x32xf32>
    %cst_57 = arith.constant 5.000000e-01 : f32
    %137 = vector.broadcast %cst_57 : f32 to vector<8x32xf32>
    %138 = arith.mulf %136, %137 : vector<8x32xf32>
    %cst_58 = arith.constant 5.000000e-01 : f32
    %139 = vector.broadcast %cst_58 : f32 to vector<8x32xf32>
    %140 = arith.addf %138, %139 : vector<8x32xf32>
    %141 = arith.mulf %134, %116 : vector<8x32xf32>
    %142 = arith.mulf %129, %135 : vector<8x32xf32>
    %143 = arith.addf %141, %142 : vector<8x32xf32>
    %144 = math.tanh %143 : vector<8x32xf32>
    %145 = arith.mulf %140, %144 : vector<8x32xf32>
    %c40 = arith.constant 40 : index
    %c0_59 = arith.constant 0 : index
    %146 = vector.load %arg7[%c40, %c0_59] : memref<64x128xf32, #tpu.memory_space<vmem>>, vector<8x128xf32>
    %147 = arith.truncf %145 : vector<8x32xf32> to vector<8x32xbf16>
    %c0_60 = arith.constant 0 : index
    %c0_61 = arith.constant 0 : index
    %148 = vector.load %arg2[%c0_60, %c0_61] : memref<32x128xbf16, #tpu.memory_space<vmem>>, vector<32x128xbf16>
    %cst_62 = arith.constant dense<0.000000e+00> : vector<8x128xf32>
    %149 = tpu.matmul %147, %148, %cst_62 {dimension_numbers = #tpu.dot_dimension_numbers<[1], [0], [0], [1], [0, 0, 1, 1], [], []>} : vector<8x32xbf16>, vector<32x128xbf16>, vector<8x128xf32> -> vector<8x128xf32>
    %150 = arith.addf %146, %149 : vector<8x128xf32>
    %151 = math.tanh %150 : vector<8x128xf32>
    %152 = vector.extract_strided_slice %151 {offsets = [0, 0], sizes = [8, 32], strides = [1, 1]} : vector<8x128xf32> to vector<8x32xf32>
    %cst_63 = arith.constant 5.000000e-01 : f32
    %153 = vector.broadcast %cst_63 : f32 to vector<8x32xf32>
    %154 = arith.mulf %152, %153 : vector<8x32xf32>
    %cst_64 = arith.constant 5.000000e-01 : f32
    %155 = vector.broadcast %cst_64 : f32 to vector<8x32xf32>
    %156 = arith.addf %154, %155 : vector<8x32xf32>
    %157 = vector.extract_strided_slice %151 {offsets = [0, 32], sizes = [8, 32], strides = [1, 1]} : vector<8x128xf32> to vector<8x32xf32>
    %cst_65 = arith.constant 5.000000e-01 : f32
    %158 = vector.broadcast %cst_65 : f32 to vector<8x32xf32>
    %159 = arith.mulf %157, %158 : vector<8x32xf32>
    %cst_66 = arith.constant 5.000000e-01 : f32
    %160 = vector.broadcast %cst_66 : f32 to vector<8x32xf32>
    %161 = arith.addf %159, %160 : vector<8x32xf32>
    %162 = vector.extract_strided_slice %151 {offsets = [0, 64], sizes = [8, 32], strides = [1, 1]} : vector<8x128xf32> to vector<8x32xf32>
    %163 = vector.extract_strided_slice %151 {offsets = [0, 96], sizes = [8, 32], strides = [1, 1]} : vector<8x128xf32> to vector<8x32xf32>
    %cst_67 = arith.constant 5.000000e-01 : f32
    %164 = vector.broadcast %cst_67 : f32 to vector<8x32xf32>
    %165 = arith.mulf %163, %164 : vector<8x32xf32>
    %cst_68 = arith.constant 5.000000e-01 : f32
    %166 = vector.broadcast %cst_68 : f32 to vector<8x32xf32>
    %167 = arith.addf %165, %166 : vector<8x32xf32>
    %168 = arith.mulf %161, %143 : vector<8x32xf32>
    %169 = arith.mulf %156, %162 : vector<8x32xf32>
    %170 = arith.addf %168, %169 : vector<8x32xf32>
    %171 = math.tanh %170 : vector<8x32xf32>
    %172 = arith.mulf %167, %171 : vector<8x32xf32>
    %c48 = arith.constant 48 : index
    %c0_69 = arith.constant 0 : index
    %173 = vector.load %arg7[%c48, %c0_69] : memref<64x128xf32, #tpu.memory_space<vmem>>, vector<8x128xf32>
    %174 = arith.truncf %172 : vector<8x32xf32> to vector<8x32xbf16>
    %c0_70 = arith.constant 0 : index
    %c0_71 = arith.constant 0 : index
    %175 = vector.load %arg2[%c0_70, %c0_71] : memref<32x128xbf16, #tpu.memory_space<vmem>>, vector<32x128xbf16>
    %cst_72 = arith.constant dense<0.000000e+00> : vector<8x128xf32>
    %176 = tpu.matmul %174, %175, %cst_72 {dimension_numbers = #tpu.dot_dimension_numbers<[1], [0], [0], [1], [0, 0, 1, 1], [], []>} : vector<8x32xbf16>, vector<32x128xbf16>, vector<8x128xf32> -> vector<8x128xf32>
    %177 = arith.addf %173, %176 : vector<8x128xf32>
    %178 = math.tanh %177 : vector<8x128xf32>
    %179 = vector.extract_strided_slice %178 {offsets = [0, 0], sizes = [8, 32], strides = [1, 1]} : vector<8x128xf32> to vector<8x32xf32>
    %cst_73 = arith.constant 5.000000e-01 : f32
    %180 = vector.broadcast %cst_73 : f32 to vector<8x32xf32>
    %181 = arith.mulf %179, %180 : vector<8x32xf32>
    %cst_74 = arith.constant 5.000000e-01 : f32
    %182 = vector.broadcast %cst_74 : f32 to vector<8x32xf32>
    %183 = arith.addf %181, %182 : vector<8x32xf32>
    %184 = vector.extract_strided_slice %178 {offsets = [0, 32], sizes = [8, 32], strides = [1, 1]} : vector<8x128xf32> to vector<8x32xf32>
    %cst_75 = arith.constant 5.000000e-01 : f32
    %185 = vector.broadcast %cst_75 : f32 to vector<8x32xf32>
    %186 = arith.mulf %184, %185 : vector<8x32xf32>
    %cst_76 = arith.constant 5.000000e-01 : f32
    %187 = vector.broadcast %cst_76 : f32 to vector<8x32xf32>
    %188 = arith.addf %186, %187 : vector<8x32xf32>
    %189 = vector.extract_strided_slice %178 {offsets = [0, 64], sizes = [8, 32], strides = [1, 1]} : vector<8x128xf32> to vector<8x32xf32>
    %190 = vector.extract_strided_slice %178 {offsets = [0, 96], sizes = [8, 32], strides = [1, 1]} : vector<8x128xf32> to vector<8x32xf32>
    %cst_77 = arith.constant 5.000000e-01 : f32
    %191 = vector.broadcast %cst_77 : f32 to vector<8x32xf32>
    %192 = arith.mulf %190, %191 : vector<8x32xf32>
    %cst_78 = arith.constant 5.000000e-01 : f32
    %193 = vector.broadcast %cst_78 : f32 to vector<8x32xf32>
    %194 = arith.addf %192, %193 : vector<8x32xf32>
    %195 = arith.mulf %188, %170 : vector<8x32xf32>
    %196 = arith.mulf %183, %189 : vector<8x32xf32>
    %197 = arith.addf %195, %196 : vector<8x32xf32>
    %198 = math.tanh %197 : vector<8x32xf32>
    %199 = arith.mulf %194, %198 : vector<8x32xf32>
    %c56 = arith.constant 56 : index
    %c0_79 = arith.constant 0 : index
    %200 = vector.load %arg7[%c56, %c0_79] : memref<64x128xf32, #tpu.memory_space<vmem>>, vector<8x128xf32>
    %201 = arith.truncf %199 : vector<8x32xf32> to vector<8x32xbf16>
    %c0_80 = arith.constant 0 : index
    %c0_81 = arith.constant 0 : index
    %202 = vector.load %arg2[%c0_80, %c0_81] : memref<32x128xbf16, #tpu.memory_space<vmem>>, vector<32x128xbf16>
    %cst_82 = arith.constant dense<0.000000e+00> : vector<8x128xf32>
    %203 = tpu.matmul %201, %202, %cst_82 {dimension_numbers = #tpu.dot_dimension_numbers<[1], [0], [0], [1], [0, 0, 1, 1], [], []>} : vector<8x32xbf16>, vector<32x128xbf16>, vector<8x128xf32> -> vector<8x128xf32>
    %204 = arith.addf %200, %203 : vector<8x128xf32>
    %205 = math.tanh %204 : vector<8x128xf32>
    %206 = vector.extract_strided_slice %205 {offsets = [0, 0], sizes = [8, 32], strides = [1, 1]} : vector<8x128xf32> to vector<8x32xf32>
    %cst_83 = arith.constant 5.000000e-01 : f32
    %207 = vector.broadcast %cst_83 : f32 to vector<8x32xf32>
    %208 = arith.mulf %206, %207 : vector<8x32xf32>
    %cst_84 = arith.constant 5.000000e-01 : f32
    %209 = vector.broadcast %cst_84 : f32 to vector<8x32xf32>
    %210 = arith.addf %208, %209 : vector<8x32xf32>
    %211 = vector.extract_strided_slice %205 {offsets = [0, 32], sizes = [8, 32], strides = [1, 1]} : vector<8x128xf32> to vector<8x32xf32>
    %cst_85 = arith.constant 5.000000e-01 : f32
    %212 = vector.broadcast %cst_85 : f32 to vector<8x32xf32>
    %213 = arith.mulf %211, %212 : vector<8x32xf32>
    %cst_86 = arith.constant 5.000000e-01 : f32
    %214 = vector.broadcast %cst_86 : f32 to vector<8x32xf32>
    %215 = arith.addf %213, %214 : vector<8x32xf32>
    %216 = vector.extract_strided_slice %205 {offsets = [0, 64], sizes = [8, 32], strides = [1, 1]} : vector<8x128xf32> to vector<8x32xf32>
    %217 = vector.extract_strided_slice %205 {offsets = [0, 96], sizes = [8, 32], strides = [1, 1]} : vector<8x128xf32> to vector<8x32xf32>
    %cst_87 = arith.constant 5.000000e-01 : f32
    %218 = vector.broadcast %cst_87 : f32 to vector<8x32xf32>
    %219 = arith.mulf %217, %218 : vector<8x32xf32>
    %cst_88 = arith.constant 5.000000e-01 : f32
    %220 = vector.broadcast %cst_88 : f32 to vector<8x32xf32>
    %221 = arith.addf %219, %220 : vector<8x32xf32>
    %222 = arith.mulf %215, %197 : vector<8x32xf32>
    %223 = arith.mulf %210, %216 : vector<8x32xf32>
    %224 = arith.addf %222, %223 : vector<8x32xf32>
    %225 = math.tanh %224 : vector<8x32xf32>
    %226 = arith.mulf %221, %225 : vector<8x32xf32>
    %227 = arith.truncf %226 : vector<8x32xf32> to vector<8x32xbf16>
    %c0_89 = arith.constant 0 : index
    %c0_90 = arith.constant 0 : index
    %228 = vector.load %arg4[%c0_89, %c0_90] : memref<32x128xbf16, #tpu.memory_space<vmem>>, vector<32x128xbf16>
    %cst_91 = arith.constant dense<0.000000e+00> : vector<8x128xf32>
    %229 = tpu.matmul %227, %228, %cst_91 {dimension_numbers = #tpu.dot_dimension_numbers<[1], [0], [0], [1], [0, 0, 1, 1], [], []>} : vector<8x32xbf16>, vector<32x128xbf16>, vector<8x128xf32> -> vector<8x128xf32>
    %c0_92 = arith.constant 0 : index
    %c0_93 = arith.constant 0 : index
    %230 = vector.load %arg5[%c0_92, %c0_93] : memref<1x128xf32, #tpu.memory_space<vmem>>, vector<1x128xf32>
    %231 = vector.broadcast %230 : vector<1x128xf32> to vector<8x128xf32>
    %232 = arith.addf %229, %231 : vector<8x128xf32>
    %c0_94 = arith.constant 0 : index
    %c0_95 = arith.constant 0 : index
    %233 = vector.load %arg6[%c0_94, %c0_95] : memref<8x128xf32, #tpu.memory_space<vmem>>, vector<8x128xf32>
    tpu.vector_store %arg6[%c0_94, %c0_95], %232 {strides = array<i32>} : memref<8x128xf32, #tpu.memory_space<vmem>>, vector<8x128xf32>,
    return
  }
}

</mosaic_0001>

<bundles_post_ra>
// kernel: lstm_forward.1
= control target key start
LH: loop header
LB: loop body
LE: loop exit
PB: predicated region body
PF: predicated region fallthrough
CT: control target
= control target key end

     0   :  { %v567_v1 = vmov 0   ;;  %s568_s30 = smov 64   ;;  %vm121_vm0 = vcmask 261120   ;;  %s713_s2 = inlined_call_operand.vmem [shape: bf16[32,128], index: 2, kind: input, shape index: {}]   ;;  %s714_s0 = inlined_call_operand.vmem [shape: f32[64,1], index: 0, kind: input, shape index: {}]   ;;  %s715_s1 = inlined_call_operand.vmem [shape: f32[1,128], index: 1, kind: input, shape index: {}]   ;;  %s716_s3 = inlined_call_operand.vmem [shape: f32[1,128], index: 3, kind: input, shape index: {}]   ;;  %s717_s4 = inlined_call_operand.vmem [shape: bf16[32,128], index: 4, kind: input, shape index: {}]   ;;  %s718_s5 = inlined_call_operand.vmem [shape: f32[1,128], index: 5, kind: input, shape index: {}]   ;;  %s719_s6 = inlined_call_operand.vmem [shape: f32[8,128], index: 6, kind: output, shape index: {}]  }
   0x1   :  { %v523_v0 = vld [vmem:[%s713_s2 + $0x8] sm:$0xff]  ;;  %529 = vset.pattern.permute.xlu0 %v567_v1  ;;  %v24_v2 = vld [vmem:[%s714_s0] sm:$0xff]  ;;  %530 = vset.pattern.permute.xlu2 %v567_v1  ;;  %v26_v44 = vld [vmem:[%s714_s0 + $0x10] sm:$0xff] }
   0x2   :  { %35 = vperm.xlu0 %529, %v24_v2   ;;  %531 = vset.pattern.permute.xlu1 %v567_v1  ;;  %v522_v3 = vld [vmem:[%s713_s2] sm:$0xff]  ;;  %v25_v24 = vld [vmem:[%s714_s0 + $0x8] sm:$0xff]  ;;  %v27_v57 = vld [vmem:[%s714_s0 + $0x18] sm:$0xff] }
   0x3   :  { %131 = vmatpush.bf16.msra.mxu0 %v523_v0  ;;  %173 = vmatpush.bf16.msra.mxu1 %v523_v0  ;;  %v617_v4 = vld [vmem:[%s715_s1] ss:$0 sm:$0xff]  ;;  %s569_s1 = smov 32  }
   0x4   :  { %215 = vmatpush.bf16.msra.mxu2 %v523_v0  ;;  %257 = vmatpush.bf16.msra.mxu3 %v523_v0  ;;  %v623_v7 = vld [vmem:[%s716_s3] ss:$0 sm:$0xff] }
   0x7   :  { %132 = vmatpush.bf16.msra.mxu0 %v522_v3  ;;  %174 = vmatpush.bf16.msra.mxu1 %v522_v3 }
   0x8   :  { %216 = vmatpush.bf16.msra.mxu2 %v522_v3  ;;  %258 = vmatpush.bf16.msra.mxu3 %v522_v3 }
   0xa   :  { %133 = vmatmul.bf16.vlgmr.msra.gmra.mxu0 %v567_v1 }
   0xb   :  { %299 = vmatpush.bf16.msrb.mxu0 %v523_v0  ;;  %341 = vmatpush.bf16.msrb.mxu1 %v523_v0 }
   0xc   :  { %383 = vmatpush.bf16.msrb.mxu2 %v523_v0  ;;  %425 = vmatpush.bf16.msrb.mxu3 %v523_v0 }
   0xf   :  { %300 = vmatpush.bf16.msrb.mxu0 %v522_v3  ;;  %342 = vmatpush.bf16.msrb.mxu1 %v522_v3 }
  0x10   :  { %384 = vmatpush.bf16.msrb.mxu2 %v522_v3  ;;  %426 = vmatpush.bf16.msrb.mxu3 %v522_v3 }
  0x74   :  { %v36_v5 = vpop.permute.xlu0 %35 }
  0x75   :  { %v76_v6 = vmul.f32 %v617_v4, %v36_v5 }
  0x77   :  { %v88_v8 = vadd.f32 %v623_v7, %v76_v6 }
  0x87   :  { %v134_v9 = vpop.f32.mrf.mxu0 }
  0x88   :  { %v138_v10 = vadd.f32 %v134_v9, %v88_v8 }
  0x8a   :  { %535 = vtanh.f32 %v138_v10 }
  0x8f   :  { %v136_v11 = vpop.f32.mrf.mxu0 }
  0x90   :  { %v536_v12 = vpop.eup %535 }
  0x91   :  { %144 = vrot.lane.b32.xlu0 %v536_v12, %s568_s30  ;;  %v140_v13 = vmul.f32 0.5, %v536_v12 }
  0x93   :  { %v141_v14 = vadd.f32 0.5, %v140_v13 }
  0x95   :  { %v142_v17 = vmul.f32 0.0, %v141_v14 }
 0x103   :  { %v145_v15 = vpop.permute.xlu0 %144 }
 0x104   :  { %v147_v16 = vmul.f32 %v145_v15, %v141_v14  ;;  %v28_v15 = vld [vmem:[%s714_s0 + $0x20] sm:$0xff] }
 0x106   :  { %149 = vrot.lane.b32.xlu1 %v147_v16, %s569_s1 }
 0x178   :  { %v150_v18 = vpop.permute.xlu1 %149 }
 0x179   :  { %v152_v19 = vadd.f32 %v150_v18, %v142_v17 }
 0x17b   :  { %537 = vtanh.f32 %v152_v19 }
 0x181   :  { %v538_v20 = vpop.eup %537 }
 0x182   :  { %155 = vrot.lane.b32.xlu1 %v538_v20, %s568_s30 }
 0x1f4   :  { %v156_v21 = vpop.permute.xlu1 %155 }
 0x1f5   :  { %v158_v22 = vmul.f32 %v156_v21, %v141_v14 }
 0x1f7   :  { %v160_v23 = vpack.c.bf16 %v158_v22, %v158_v22 }
 0x1f9   :  { %162 = vrot.lane.b32.xlu2 %v160_v23, %s569_s1 }
 0x201   :  { %40 = vperm.xlu2 %530, %v25_v24  }
 0x253   :  { %v163_v25 = vpop.permute.xlu2 %162 }
 0x254   :  { %506 = vmatmul.msk.bf16.vlgmr.msra.gmra.mxu1 %vm121_vm0, %v163_v25 }
 0x25b   :  { %v41_v26 = vpop.permute.xlu2 %40 }
 0x25c   :  { %v77_v27 = vmul.f32 %v617_v4, %v41_v26 }
 0x25e   :  { %v89_v28 = vadd.f32 %v623_v7, %v77_v27 }
 0x2d1   :  { %v176_v29 = vpop.f32.mrf.mxu1 }
 0x2d2   :  { %v180_v30 = vadd.f32 %v176_v29, %v89_v28 }
 0x2d4   :  { %539 = vtanh.f32 %v180_v30 }
 0x2d9   :  { %v178_v31 = vpop.f32.mrf.mxu1 }
 0x2da   :  { %v540_v32 = vpop.eup %539 }
 0x2db   :  { %186 = vrot.lane.b32.xlu0 %v540_v32, %s568_s30  ;;  %v182_v33 = vmul.f32 0.5, %v540_v32 }
 0x2dd   :  { %v183_v34 = vadd.f32 0.5, %v182_v33 }
 0x2df   :  { %v184_v37 = vmul.f32 %v183_v34, %v152_v19 }
 0x34d   :  { %v187_v35 = vpop.permute.xlu0 %186 }
 0x34e   :  { %v189_v36 = vmul.f32 %v187_v35, %v183_v34  ;;  %v29_v35 = vld [vmem:[%s714_s0 + $0x28] sm:$0xff] }
 0x350   :  { %191 = vrot.lane.b32.xlu1 %v189_v36, %s569_s1 }
 0x358   :  { %45 = vperm.xlu1 %531, %v26_v44  }
 0x3c2   :  { %v192_v38 = vpop.permute.xlu1 %191 }
 0x3c3   :  { %v194_v39 = vadd.f32 %v192_v38, %v184_v37 }
 0x3c5   :  { %541 = vtanh.f32 %v194_v39 }
 0x3ca   :  { %v46_v46 = vpop.permute.xlu1 %45 }
 0x3cb   :  { %v542_v40 = vpop.eup %541  ;;  %v78_v47 = vmul.f32 %v617_v4, %v46_v46 }
 0x3cc   :  { %197 = vrot.lane.b32.xlu2 %v542_v40, %s568_s30 }
 0x3cd   :  { %v90_v48 = vadd.f32 %v623_v7, %v78_v47 }
 0x426   :  { %v198_v41 = vpop.permute.xlu2 %197 }
 0x427   :  { %v200_v42 = vmul.f32 %v198_v41, %v183_v34 }
 0x429   :  { %v202_v43 = vpack.c.bf16 %v200_v42, %v200_v42 }
 0x42b   :  { %204 = vrot.lane.b32.xlu0 %v202_v43, %s569_s1 }
 0x49d   :  { %v205_v45 = vpop.permute.xlu0 %204 }
 0x49e   :  { %507 = vmatmul.msk.bf16.vlgmr.msra.gmra.mxu2 %vm121_vm0, %v205_v45 }
 0x521   :  { %v218_v49 = vpop.f32.mrf.mxu2 }
 0x522   :  { %v222_v50 = vadd.f32 %v218_v49, %v90_v48 }
 0x524   :  { %543 = vtanh.f32 %v222_v50 }
 0x529   :  { %v220_v51 = vpop.f32.mrf.mxu2 }
 0x52a   :  { %v544_v52 = vpop.eup %543 }
 0x52b   :  { %228 = vrot.lane.b32.xlu2 %v544_v52, %s568_s30  ;;  %v224_v53 = vmul.f32 0.5, %v544_v52 }
 0x52d   :  { %v225_v54 = vadd.f32 0.5, %v224_v53 }
 0x52f   :  { %v226_v58 = vmul.f32 %v225_v54, %v194_v39 }
 0x585   :  { %v229_v55 = vpop.permute.xlu2 %228 }
 0x586   :  { %v231_v56 = vmul.f32 %v229_v55, %v225_v54  ;;  %v30_v55 = vld [vmem:[%s714_s0 + $0x30] sm:$0xff] }
 0x588   :  { %233 = vrot.lane.b32.xlu0 %v231_v56, %s569_s1 }
 0x590   :  { %50 = vperm.xlu0 %529, %v27_v57  }
 0x5fa   :  { %v234_v59 = vpop.permute.xlu0 %233 }
 0x5fb   :  { %v236_v60 = vadd.f32 %v234_v59, %v226_v58 }
 0x5fd   :  { %545 = vtanh.f32 %v236_v60 }
 0x602   :  { %v51_v2 = vpop.permute.xlu0 %50 }
 0x603   :  { %v546_v61 = vpop.eup %545  ;;  %v79_v3 = vmul.f32 %v617_v4, %v51_v2 }
 0x604   :  { %239 = vrot.lane.b32.xlu1 %v546_v61, %s568_s30 }
 0x605   :  { %v91_v5 = vadd.f32 %v623_v7, %v79_v3 }
 0x676   :  { %v240_v62 = vpop.permute.xlu1 %239 }
 0x677   :  { %v242_v63 = vmul.f32 %v240_v62, %v225_v54 }
 0x679   :  { %v244_v0 = vpack.c.bf16 %v242_v63, %v242_v63 }
 0x67b   :  { %246 = vrot.lane.b32.xlu2 %v244_v0, %s569_s1 }
 0x6d5   :  { %v247_v1 = vpop.permute.xlu2 %246 }
 0x6d6   :  { %508 = vmatmul.msk.bf16.vlgmr.msra.gmra.mxu3 %vm121_vm0, %v247_v1 }
 0x759   :  { %v260_v6 = vpop.f32.mrf.mxu3 }
 0x75a   :  { %v264_v8 = vadd.f32 %v260_v6, %v91_v5 }
 0x75c   :  { %547 = vtanh.f32 %v264_v8 }
 0x761   :  { %v262_v9 = vpop.f32.mrf.mxu3 }
 0x762   :  { %v548_v10 = vpop.eup %547 }
 0x763   :  { %270 = vrot.lane.b32.xlu1 %v548_v10, %s568_s30  ;;  %v266_v11 = vmul.f32 0.5, %v548_v10 }
 0x765   :  { %v267_v12 = vadd.f32 0.5, %v266_v11 }
 0x767   :  { %v268_v16 = vmul.f32 %v267_v12, %v236_v60 }
 0x7d5   :  { %v271_v13 = vpop.permute.xlu1 %270 }
 0x7d6   :  { %v273_v14 = vmul.f32 %v271_v13, %v267_v12  ;;  %v31_v13 = vld [vmem:[%s714_s0 + $0x38] sm:$0xff] }
 0x7d8   :  { %275 = vrot.lane.b32.xlu2 %v273_v14, %s569_s1 }
 0x7e0   :  { %55 = vperm.xlu2 %530, %v28_v15  }
 0x832   :  { %v276_v17 = vpop.permute.xlu2 %275 }
 0x833   :  { %v278_v18 = vadd.f32 %v276_v17, %v268_v16 }
 0x835   :  { %549 = vtanh.f32 %v278_v18 }
 0x83a   :  { %v56_v24 = vpop.permute.xlu2 %55 }
 0x83b   :  { %v550_v19 = vpop.eup %549  ;;  %v80_v25 = vmul.f32 %v617_v4, %v56_v24 }
 0x83c   :  { %281 = vrot.lane.b32.xlu0 %v550_v19, %s568_s30 }
 0x83d   :  { %v92_v26 = vadd.f32 %v623_v7, %v80_v25 }
 0x8ae   :  { %v282_v20 = vpop.permute.xlu0 %281 }
 0x8af   :  { %v284_v21 = vmul.f32 %v282_v20, %v267_v12 }
 0x8b1   :  { %v286_v22 = vpack.c.bf16 %v284_v21, %v284_v21 }
 0x8b3   :  { %288 = vrot.lane.b32.xlu1 %v286_v22, %s569_s1 }
 0x925   :  { %v289_v23 = vpop.permute.xlu1 %288 }
 0x926   :  { %509 = vmatmul.msk.bf16.vlgmr.msrb.gmra.mxu0 %vm121_vm0, %v289_v23 }
 0x9a3   :  { %v302_v27 = vpop.f32.mrf.mxu0 }
 0x9a4   :  { %v306_v28 = vadd.f32 %v302_v27, %v92_v26 }
 0x9a6   :  { %551 = vtanh.f32 %v306_v28 }
 0x9ab   :  { %v304_v29 = vpop.f32.mrf.mxu0 }
 0x9ac   :  { %v552_v30 = vpop.eup %551 }
 0x9ad   :  { %312 = vrot.lane.b32.xlu0 %v552_v30, %s568_s30  ;;  %v308_v31 = vmul.f32 0.5, %v552_v30 }
 0x9af   :  { %v309_v32 = vadd.f32 0.5, %v308_v31 }
 0x9b1   :  { %v310_v36 = vmul.f32 %v309_v32, %v278_v18 }
 0xa1f   :  { %v313_v33 = vpop.permute.xlu0 %312 }
 0xa20   :  { %v315_v34 = vmul.f32 %v313_v33, %v309_v32 }
 0xa22   :  { %317 = vrot.lane.b32.xlu1 %v315_v34, %s569_s1 }
 0xa2a   :  { %60 = vperm.xlu1 %531, %v29_v35  }
 0xa94   :  { %v318_v37 = vpop.permute.xlu1 %317 }
 0xa95   :  { %v320_v38 = vadd.f32 %v318_v37, %v310_v36  ;;  %v524_v36 = vld [vmem:[%s717_s4] sm:$0xff] }
 0xa97   :  { %553 = vtanh.f32 %v320_v38 }
 0xa9c   :  { %v61_v44 = vpop.permute.xlu1 %60 }
 0xa9d   :  { %v554_v39 = vpop.eup %553  ;;  %v81_v45 = vmul.f32 %v617_v4, %v61_v44 }
 0xa9e   :  { %323 = vrot.lane.b32.xlu2 %v554_v39, %s568_s30 }
 0xa9f   :  { %v93_v46 = vadd.f32 %v623_v7, %v81_v45 }
 0xaf8   :  { %v324_v40 = vpop.permute.xlu2 %323 }
 0xaf9   :  { %v326_v41 = vmul.f32 %v324_v40, %v309_v32 }
 0xafb   :  { %v328_v42 = vpack.c.bf16 %v326_v41, %v326_v41  ;;  %v534_v41 = vld [vmem:[%s718_s5] ss:$0 sm:$0xff] }
 0xafd   :  { %330 = vrot.lane.b32.xlu0 %v328_v42, %s569_s1 }
 0xb6f   :  { %v331_v43 = vpop.permute.xlu0 %330 }
 0xb70   :  { %510 = vmatmul.msk.bf16.vlgmr.msrb.gmra.mxu1 %vm121_vm0, %v331_v43 }
 0xbed   :  { %v344_v47 = vpop.f32.mrf.mxu1 }
 0xbee   :  { %v348_v48 = vadd.f32 %v344_v47, %v93_v46 }
 0xbf0   :  { %555 = vtanh.f32 %v348_v48 }
 0xbf5   :  { %v346_v49 = vpop.f32.mrf.mxu1 }
 0xbf6   :  { %v556_v50 = vpop.eup %555 }
 0xbf7   :  { %354 = vrot.lane.b32.xlu2 %v556_v50, %s568_s30  ;;  %v350_v51 = vmul.f32 0.5, %v556_v50 }
 0xbf9   :  { %v351_v52 = vadd.f32 0.5, %v350_v51 }
 0xbfb   :  { %v352_v56 = vmul.f32 %v351_v52, %v320_v38 }
 0xc51   :  { %v355_v53 = vpop.permute.xlu2 %354 }
 0xc52   :  { %v357_v54 = vmul.f32 %v355_v53, %v351_v52 }
 0xc54   :  { %359 = vrot.lane.b32.xlu0 %v357_v54, %s569_s1 }
 0xc5c   :  { %65 = vperm.xlu0 %529, %v30_v55  }
 0xcc6   :  { %v360_v57 = vpop.permute.xlu0 %359 }
 0xcc7   :  { %v362_v58 = vadd.f32 %v360_v57, %v352_v56 }
 0xcc9   :  { %557 = vtanh.f32 %v362_v58 }
 0xcce   :  { %v66_v0 = vpop.permute.xlu0 %65 }
 0xccf   :  { %v558_v59 = vpop.eup %557  ;;  %v82_v1 = vmul.f32 %v617_v4, %v66_v0 }
 0xcd0   :  { %365 = vrot.lane.b32.xlu1 %v558_v59, %s568_s30 }
 0xcd1   :  { %v94_v2 = vadd.f32 %v623_v7, %v82_v1 }
 0xd42   :  { %v366_v60 = vpop.permute.xlu1 %365 }
 0xd43   :  { %v368_v61 = vmul.f32 %v366_v60, %v351_v52 }
 0xd45   :  { %v370_v62 = vpack.c.bf16 %v368_v61, %v368_v61 }
 0xd47   :  { %372 = vrot.lane.b32.xlu2 %v370_v62, %s569_s1 }
 0xda1   :  { %v373_v63 = vpop.permute.xlu2 %372 }
 0xda2   :  { %511 = vmatmul.msk.bf16.vlgmr.msrb.gmra.mxu2 %vm121_vm0, %v373_v63 }
 0xe25   :  { %v386_v3 = vpop.f32.mrf.mxu2 }
 0xe26   :  { %v390_v5 = vadd.f32 %v386_v3, %v94_v2 }
 0xe28   :  { %559 = vtanh.f32 %v390_v5 }
 0xe2d   :  { %v388_v6 = vpop.f32.mrf.mxu2 }
 0xe2e   :  { %v560_v8 = vpop.eup %559 }
 0xe2f   :  { %396 = vrot.lane.b32.xlu1 %v560_v8, %s568_s30  ;;  %v392_v9 = vmul.f32 0.5, %v560_v8 }
 0xe31   :  { %v393_v10 = vadd.f32 0.5, %v392_v9 }
 0xe33   :  { %v394_v14 = vmul.f32 %v393_v10, %v362_v58 }
 0xea1   :  { %v397_v11 = vpop.permute.xlu1 %396 }
 0xea2   :  { %v399_v12 = vmul.f32 %v397_v11, %v393_v10 }
 0xea4   :  { %401 = vrot.lane.b32.xlu2 %v399_v12, %s569_s1 }
 0xeac   :  { %70 = vperm.xlu2 %530, %v31_v13  }
 0xefe   :  { %v402_v15 = vpop.permute.xlu2 %401 }
 0xeff   :  { %v404_v16 = vadd.f32 %v402_v15, %v394_v14 }
 0xf01   :  { %561 = vtanh.f32 %v404_v16 }
 0xf06   :  { %v71_v22 = vpop.permute.xlu2 %70 }
 0xf07   :  { %v562_v17 = vpop.eup %561  ;;  %v83_v23 = vmul.f32 %v617_v4, %v71_v22 }
 0xf08   :  { %407 = vrot.lane.b32.xlu0 %v562_v17, %s568_s30 }
 0xf09   :  { %v95_v24 = vadd.f32 %v623_v7, %v83_v23  ;;  %v525_v7 = vld [vmem:[%s717_s4 + $0x8] sm:$0xff] }
 0xf0a   :  { %486 = vmatpush.bf16.msra.mxu0 %v525_v7 }
 0xf0e   :  { %487 = vmatpush.bf16.msra.mxu0 %v524_v36 }
 0xf7a   :  { %v408_v18 = vpop.permute.xlu0 %407 }
 0xf7b   :  { %v410_v19 = vmul.f32 %v408_v18, %v393_v10 }
 0xf7d   :  { %v412_v20 = vpack.c.bf16 %v410_v19, %v410_v19 }
 0xf7f   :  { %414 = vrot.lane.b32.xlu1 %v412_v20, %s569_s1 }
 0xff1   :  { %v415_v21 = vpop.permute.xlu1 %414 }
 0xff2   :  { %512 = vmatmul.msk.bf16.vlgmr.msrb.gmra.mxu3 %vm121_vm0, %v415_v21 }
0x1075   :  { %v428_v25 = vpop.f32.mrf.mxu3 }
0x1076   :  { %v432_v26 = vadd.f32 %v428_v25, %v95_v24 }
0x1078   :  { %563 = vtanh.f32 %v432_v26 }
0x107d   :  { %v430_v27 = vpop.f32.mrf.mxu3 }
0x107e   :  { %v564_v28 = vpop.eup %563 }
0x107f   :  { %438 = vrot.lane.b32.xlu0 %v564_v28, %s568_s30  ;;  %v434_v29 = vmul.f32 0.5, %v564_v28 }
0x1081   :  { %v435_v30 = vadd.f32 0.5, %v434_v29 }
0x1083   :  { %v436_v33 = vmul.f32 %v435_v30, %v404_v16 }
0x10f1   :  { %v439_v31 = vpop.permute.xlu0 %438 }
0x10f2   :  { %v441_v32 = vmul.f32 %v439_v31, %v435_v30 }
0x10f4   :  { %443 = vrot.lane.b32.xlu1 %v441_v32, %s569_s1 }
0x1166   :  { %v444_v34 = vpop.permute.xlu1 %443 }
0x1167   :  { %v446_v35 = vadd.f32 %v444_v34, %v436_v33 }
0x1169   :  { %565 = vtanh.f32 %v446_v35 }
0x116f   :  { %v566_v4 = vpop.eup %565 }
0x1170   :  { %449 = vrot.lane.b32.xlu2 %v566_v4, %s568_s30 }
0x11ca   :  { %v450_v37 = vpop.permute.xlu2 %449 }
0x11cb   :  { %v452_v38 = vmul.f32 %v450_v37, %v435_v30 }
0x11cd   :  { %v453_v39 = vpack.c.bf16 %v452_v38, %v452_v38 }
0x11cf   :  { %463 = vrot.lane.b32.xlu0 %v453_v39, %s569_s1 }
0x1241   :  { %v464_v40 = vpop.permute.xlu0 %463 }
0x1242   :  { %521 = vmatmul.msk.bf16.vlgmr.msra.gmra.mxu0 %vm121_vm0, %v464_v40 }
0x12bf   :  { %v489_v42 = vpop.f32.mrf.mxu0 }
0x12c0   :  { %v490_v43 = vadd.f32 %v534_v41, %v489_v42 }
0x12c2   :  { %493 = vst [vmem:[%s719_s6] sm:$0xff] %v490_v43 }
0x12c7   :  { %v491_v44 = vpop.f32.mrf.mxu0 }

</bundles_post_ra>
